<compile_context>
chip_gen: v7x
topology: tpu7x:2x2x1
jax: 0.10.0
libtpu: 0.0.40
codegen_flags: <defaults>
</compile_context>

<pallas_src>
import jax
import jax.numpy as jnp
from jax import lax
from jax.experimental import pallas as pl
from jax.experimental.pallas import tpu as pltpu


def _round_up(x, m):
    return ((x + m - 1) // m) * m


def _value_net_kernel(x_ref, w1_ref, b1_ref, w2_ref, b2_ref, w3_ref, b3_ref, out_ref):
    x = x_ref[...]                                   # (TB, IN) batch-major, as stored in HBM

    # Layer 1: contract both operands' "in" dims (A @ B^T pattern) so the result
    # lands as (H, TB) — batch on the lane axis, MXU output fully lane-dense.
    h1 = lax.dot_general(w1_ref[...], x,
                         (((1,), (1,)), ((), ())),
                         preferred_element_type=jnp.float32)           # (H, TB)
    h1 = jnp.maximum(h1 + b1_ref[...], 0.0)                            # (H,1) bias bcast over lanes

    # Layer 2: plain (H, H) @ (H, TB) -> (H, TB); output stays lane-dense.
    h2 = jnp.dot(w2_ref[...], h1, preferred_element_type=jnp.float32)
    h2 = jnp.maximum(h2 + b2_ref[...], 0.0)

    # Layer 3 (out_features == 1): (1, H) @ (H, TB) -> a single lane-dense row,
    # stored with unmasked vst (no (TB,1) column of masked stores).
    v = jnp.dot(w3_ref[...], h2, preferred_element_type=jnp.float32)   # (1, TB)
    out_ref[...] = (v + b3_ref[...]).astype(out_ref.dtype)


def value_network_forward(state, params, *, block_b=1024):
    """state: [B, num_inputs] float32. Returns [B, 1] float32."""
    w1, b1, w2, b2, w3, b3 = params
    B, num_inputs = state.shape

    # --- batch-tile selection ------------------------------------------------
    # * B >= 256: tb is a multiple of 128 (lane-dense (1, tb) output blocks) and
    #   is capped at ~B/2 so there are always >= 2 grid steps for v7x megacore.
    # * B < 256: a single tile spanning the whole batch (block == full array
    #   dims, so the (8,128) tiling rule is trivially satisfied, no raggedness).
    if B >= 256:
        tb = max(128, min(_round_up(block_b, 128), _round_up(pl.cdiv(B, 2), 128)))
    else:
        tb = B
    n_blocks = pl.cdiv(B, tb)

    const2d = lambda i: (0, 0)  # weights/biases: same block every step -> VMEM resident

    out_row = pl.pallas_call(
        _value_net_kernel,
        out_shape=jax.ShapeDtypeStruct((1, n_blocks * tb), jnp.float32),
        grid=(n_blocks,),
        in_specs=[
            pl.BlockSpec((tb, num_inputs), lambda i: (i, 0)),  # streamed batch tile (ragged tail OK)
            pl.BlockSpec(w1.shape, const2d),
            pl.BlockSpec(b1.shape, const2d),
            pl.BlockSpec(w2.shape, const2d),
            pl.BlockSpec(b2.shape, const2d),
            pl.BlockSpec(w3.shape, const2d),
            pl.BlockSpec(b3.shape, const2d),
        ],
        out_specs=pl.BlockSpec((1, tb), lambda i: (0, i)),     # lane-dense output row per tile
        compiler_params=pltpu.CompilerParams(
            dimension_semantics=("parallel",),                 # megacore sharding on v7x
            vmem_limit_bytes=32 * 1024 * 1024,                 # explicit headroom; safe on v5e-v7x
        ),
    )(state, w1, b1, w2, b2, w3, b3)

    # Only the (tiny, B*4-byte) output is sliced — no pad/copy of the input.
    return out_row.reshape(-1)[:B].reshape(B, 1)


def _xavier_uniform(key, shape, fan_in, fan_out, dtype=jnp.float32):
    # torch.nn.init.xavier_uniform_ with gain=1: U(-a, a), a = sqrt(6/(fan_in+fan_out))
    bound = (6.0 / (fan_in + fan_out)) ** 0.5
    return jax.random.uniform(key, shape, dtype, minval=-bound, maxval=bound)


def init_value_network_params(key, num_inputs, hidden_dim):
    """Weights in the PyTorch [out_features, in_features] layout, f32; biases as
    [out_features, 1] columns so they broadcast over the lane (batch) axis."""
    k1, k2, k3 = jax.random.split(key, 3)
    w1 = _xavier_uniform(k1, (hidden_dim, num_inputs), num_inputs, hidden_dim)
    b1 = jnp.zeros((hidden_dim, 1), jnp.float32)
    w2 = _xavier_uniform(k2, (hidden_dim, hidden_dim), hidden_dim, hidden_dim)
    b2 = jnp.zeros((hidden_dim, 1), jnp.float32)
    w3 = _xavier_uniform(k3, (1, hidden_dim), hidden_dim, 1)
    b3 = jnp.zeros((1, 1), jnp.float32)
    return (w1, b1, w2, b2, w3, b3)


def value_network_ref(state, params):
    """Pure-JAX f32 reference of the PyTorch forward."""
    w1, b1, w2, b2, w3, b3 = params
    h1 = jnp.maximum(state @ w1.T + b1.T, 0.0)
    h2 = jnp.maximum(h1 @ w2.T + b2.T, 0.0)
    return h2 @ w3.T + b3.T                                    # [B, 1]


if __name__ == "__main__":
    num_inputs = 16
    hidden_dim = 32

    key = jax.random.PRNGKey(0)
    kp, kb, ks1, ks2, ks3 = jax.random.split(key, 5)
    w1, _, w2, _, w3, _ = init_value_network_params(kp, num_inputs, hidden_dim)
    # Non-zero biases (PyTorch inits them to 0) so the lane-broadcast bias path
    # is actually exercised by the numeric check; forward semantics are identical.
    kb1, kb2, kb3 = jax.random.split(kb, 3)
    params = (
        w1, 0.1 * jax.random.normal(kb1, (hidden_dim, 1), jnp.float32),
        w2, 0.1 * jax.random.normal(kb2, (hidden_dim, 1), jnp.float32),
        w3, 0.1 * jax.random.normal(kb3, (1, 1), jnp.float32),
    )

    tol = dict(atol=3e-2, rtol=3e-2)  # covers MXU default-precision differences vs XLA's f32 dot

    # Case 1: tiny batch -> single tile == full batch, single grid step.
    s1 = jax.random.normal(ks1, (2, num_inputs), jnp.float32)
    o1 = jax.block_until_ready(value_network_forward(s1, params))
    assert o1.shape == (2, 1), o1.shape
    assert jnp.allclose(o1, value_network_ref(s1, params), **tol), "mismatch (tiny batch)"

    # Case 2: B=300 -> 2 grid steps (v7x megacore path), 128-multiple tiles,
    # ragged last input tile handled by Pallas (no wrapper pad).
    s2 = jax.random.normal(ks2, (300, num_inputs), jnp.float32)
    o2 = jax.block_until_ready(value_network_forward(s2, params))
    assert o2.shape == (300, 1), o2.shape
    assert jnp.allclose(o2, value_network_ref(s2, params), **tol), "mismatch (ragged tiles)"

    # Case 3: exactly divisible batch with a small explicit block_b -> 4 grid steps.
    s3 = jax.random.normal(ks3, (512, num_inputs), jnp.float32)
    o3 = jax.block_until_ready(value_network_forward(s3, params, block_b=128))
    assert o3.shape == (512, 1), o3.shape
    assert jnp.allclose(o3, value_network_ref(s3, params), **tol), "mismatch (multi-tile)"

    print("KERNEL_OK")
</pallas_src>

<mosaic_0001>
module attributes {stable_mosaic.version = 11 : i64} {
  func.func @_value_net_kernel(%arg0: i32, %arg1: memref<2x16xf32, #tpu.memory_space<vmem>>, %arg2: memref<32x16xf32, #tpu.memory_space<vmem>>, %arg3: memref<32x1xf32, #tpu.memory_space<vmem>>, %arg4: memref<32x32xf32, #tpu.memory_space<vmem>>, %arg5: memref<32x1xf32, #tpu.memory_space<vmem>>, %arg6: memref<1x32xf32, #tpu.memory_space<vmem>>, %arg7: memref<1x1xf32, #tpu.memory_space<vmem>>, %arg8: memref<1x2xf32, #tpu.memory_space<vmem>>) attributes {dimension_semantics = [#tpu.dimension_semantics<parallel>], iteration_bounds = array<i64: 1>, scalar_prefetch = 0 : i64, scratch_operands = 0 : i64, tpu.core_type = #tpu.core_type<tc>, window_params = [{transform_indices = @transform_0, window_bounds = array<i64: 2, 16>}, {pipeline_mode = #tpu.pipeline_mode<synchronous>, transform_indices = @transform_1, window_bounds = array<i64: 32, 16>}, {pipeline_mode = #tpu.pipeline_mode<synchronous>, transform_indices = @transform_2, window_bounds = array<i64: 32, 1>}, {pipeline_mode = #tpu.pipeline_mode<synchronous>, transform_indices = @transform_3, window_bounds = array<i64: 32, 32>}, {pipeline_mode = #tpu.pipeline_mode<synchronous>, transform_indices = @transform_4, window_bounds = array<i64: 32, 1>}, {pipeline_mode = #tpu.pipeline_mode<synchronous>, transform_indices = @transform_5, window_bounds = array<i64: 1, 32>}, {pipeline_mode = #tpu.pipeline_mode<synchronous>, transform_indices = @transform_6, window_bounds = array<i64: 1, 1>}, {transform_indices = @transform_7, window_bounds = array<i64: 1, 2>}]} {
    %c0 = arith.constant 0 : index
    %c0_0 = arith.constant 0 : index
    %0 = vector.load %arg1[%c0, %c0_0] : memref<2x16xf32, #tpu.memory_space<vmem>>, vector<2x16xf32>
    %c0_1 = arith.constant 0 : index
    %c0_2 = arith.constant 0 : index
    %1 = vector.load %arg2[%c0_1, %c0_2] : memref<32x16xf32, #tpu.memory_space<vmem>>, vector<32x16xf32>
    %cst = arith.constant dense<0.000000e+00> : vector<32x2xf32>
    %2 = tpu.matmul %1, %0, %cst {dimension_numbers = #tpu.dot_dimension_numbers<[1], [1], [0], [0], [0, 0, 1, 0], [], []>} : vector<32x16xf32>, vector<2x16xf32>, vector<32x2xf32> -> vector<32x2xf32>
    %c0_3 = arith.constant 0 : index
    %c0_4 = arith.constant 0 : index
    %3 = vector.load %arg3[%c0_3, %c0_4] : memref<32x1xf32, #tpu.memory_space<vmem>>, vector<32x1xf32>
    %4 = vector.broadcast %3 : vector<32x1xf32> to vector<32x2xf32>
    %5 = arith.addf %2, %4 : vector<32x2xf32>
    %cst_5 = arith.constant 0.000000e+00 : f32
    %6 = vector.broadcast %cst_5 : f32 to vector<32x2xf32>
    %7 = arith.maximumf %5, %6 : vector<32x2xf32>
    %c0_6 = arith.constant 0 : index
    %c0_7 = arith.constant 0 : index
    %8 = vector.load %arg4[%c0_6, %c0_7] : memref<32x32xf32, #tpu.memory_space<vmem>>, vector<32x32xf32>
    %cst_8 = arith.constant dense<0.000000e+00> : vector<32x2xf32>
    %9 = tpu.matmul %8, %7, %cst_8 {dimension_numbers = #tpu.dot_dimension_numbers<[1], [0], [0], [1], [0, 0, 1, 1], [], []>} : vector<32x32xf32>, vector<32x2xf32>, vector<32x2xf32> -> vector<32x2xf32>
    %c0_9 = arith.constant 0 : index
    %c0_10 = arith.constant 0 : index
    %10 = vector.load %arg5[%c0_9, %c0_10] : memref<32x1xf32, #tpu.memory_space<vmem>>, vector<32x1xf32>
    %11 = vector.broadcast %10 : vector<32x1xf32> to vector<32x2xf32>
    %12 = arith.addf %9, %11 : vector<32x2xf32>
    %cst_11 = arith.constant 0.000000e+00 : f32
    %13 = vector.broadcast %cst_11 : f32 to vector<32x2xf32>
    %14 = arith.maximumf %12, %13 : vector<32x2xf32>
    %c0_12 = arith.constant 0 : index
    %c0_13 = arith.constant 0 : index
    %15 = vector.load %arg6[%c0_12, %c0_13] : memref<1x32xf32, #tpu.memory_space<vmem>>, vector<1x32xf32>
    %cst_14 = arith.constant dense<0.000000e+00> : vector<1x2xf32>
    %16 = tpu.matmul %15, %14, %cst_14 {dimension_numbers = #tpu.dot_dimension_numbers<[1], [0], [0], [1], [0, 0, 1, 1], [], []>} : vector<1x32xf32>, vector<32x2xf32>, vector<1x2xf32> -> vector<1x2xf32>
    %c0_15 = arith.constant 0 : index
    %c0_16 = arith.constant 0 : index
    %17 = vector.load %arg7[%c0_15, %c0_16] : memref<1x1xf32, #tpu.memory_space<vmem>>, vector<1x1xf32>
    %18 = vector.broadcast %17 : vector<1x1xf32> to vector<1x2xf32>
    %19 = arith.addf %16, %18 : vector<1x2xf32>
    %c0_17 = arith.constant 0 : index
    %c0_18 = arith.constant 0 : index
    %20 = vector.load %arg8[%c0_17, %c0_18] : memref<1x2xf32, #tpu.memory_space<vmem>>, vector<1x2xf32>
    tpu.vector_store %arg8[%c0_17, %c0_18], %19 {strides = array<i32>} : memref<1x2xf32, #tpu.memory_space<vmem>>, vector<1x2xf32>,
    return
  }
  func.func @transform_0(%arg0: i32) -> (i32, i32) {
    %c0_i32 = arith.constant 0 : i32
    %c0_i32_0 = arith.constant 0 : i32
    return %arg0, %c0_i32 : i32, i32
  }
  func.func @transform_1(%arg0: i32) -> (i32, i32) {
    %c0_i32 = arith.constant 0 : i32
    %c0_i32_0 = arith.constant 0 : i32
    %c0_i32_1 = arith.constant 0 : i32
    return %c0_i32, %c0_i32_0 : i32, i32
  }
  func.func @transform_2(%arg0: i32) -> (i32, i32) {
    %c0_i32 = arith.constant 0 : i32
    %c0_i32_0 = arith.constant 0 : i32
    %c0_i32_1 = arith.constant 0 : i32
    return %c0_i32, %c0_i32_0 : i32, i32
  }
  func.func @transform_3(%arg0: i32) -> (i32, i32) {
    %c0_i32 = arith.constant 0 : i32
    %c0_i32_0 = arith.constant 0 : i32
    %c0_i32_1 = arith.constant 0 : i32
    return %c0_i32, %c0_i32_0 : i32, i32
  }
  func.func @transform_4(%arg0: i32) -> (i32, i32) {
    %c0_i32 = arith.constant 0 : i32
    %c0_i32_0 = arith.constant 0 : i32
    %c0_i32_1 = arith.constant 0 : i32
    return %c0_i32, %c0_i32_0 : i32, i32
  }
  func.func @transform_5(%arg0: i32) -> (i32, i32) {
    %c0_i32 = arith.constant 0 : i32
    %c0_i32_0 = arith.constant 0 : i32
    %c0_i32_1 = arith.constant 0 : i32
    return %c0_i32, %c0_i32_0 : i32, i32
  }
  func.func @transform_6(%arg0: i32) -> (i32, i32) {
    %c0_i32 = arith.constant 0 : i32
    %c0_i32_0 = arith.constant 0 : i32
    %c0_i32_1 = arith.constant 0 : i32
    return %c0_i32, %c0_i32_0 : i32, i32
  }
  func.func @transform_7(%arg0: i32) -> (i32, i32) {
    %c0_i32 = arith.constant 0 : i32
    %c0_i32_0 = arith.constant 0 : i32
    return %c0_i32, %arg0 : i32, i32
  }
}

</mosaic_0001>

<bundles_post_ra>
// kernel: tpu_custom_call.1
= control target key start
LH: loop header
LB: loop body
LE: loop exit
PB: predicated region body
PF: predicated region fallthrough
CT: control target
= control target key end

     0   :  { %s624_s0 = inlined_call_operand.vmem [shape: f32[2,16], index: 0, kind: input, shape index: {}]   ;;  %s625_s1 = inlined_call_operand.vmem [shape: f32[32,16], index: 1, kind: input, shape index: {}]   ;;  %s626_s2 = inlined_call_operand.vmem [shape: f32[32,1], index: 2, kind: input, shape index: {}]   ;;  %s627_s3 = inlined_call_operand.vmem [shape: f32[32,32], index: 3, kind: input, shape index: {}]   ;;  %s628_s4 = inlined_call_operand.vmem [shape: f32[32,1], index: 4, kind: input, shape index: {}]   ;;  %s629_s5 = inlined_call_operand.vmem [shape: f32[1,32], index: 5, kind: input, shape index: {}]   ;;  %s630_s6 = inlined_call_operand.<no memory space> [shape: f32[1,1], index: 6, kind: input, shape index: {}]   ;;  %s631_s7 = inlined_call_operand.hbm [shape: f32[1,2], index: 7, kind: output, shape index: {}]  }
   0x1   :  { %v12_v0 = vstv %s630_s6 }
   0x2   :  { %13 = vst [vmem:[#allocation2] sm:$0x1] %v12_v0 }
   0x3   :  { %v29_v1 = vld [vmem:[%s624_s0] sm:$0x3]  ;;  %vm58_vm0 = vcmask 130048   ;;  %v31_v4 = vld [vmem:[%s625_s1 + $0x8] sm:$0xff]  ;;  %v499_v5 = vmov 0   ;;  %v36_v6 = vld [vmem:[%s626_s2 + $0x10] sm:$0xff] }
   0x4   :  { %v30_v2 = vld [vmem:[%s625_s1] sm:$0xff]  ;;  %421 = vmatprep.subr.msk.mxu0 %vm58_vm0, %v29_v1  ;;  %473 = vset.pattern.permute.xlu0 %v499_v5  ;;  %v32_v7 = vld [vmem:[%s625_s1 + $0x10] sm:$0xff]  ;;  %v35_v8 = vld [vmem:[%s626_s2 + $0x8] sm:$0xff] }
   0x5   :  { %423 = vmatprep.mubr.msk.f32.mxu0 %vm58_vm0, %v30_v2  ;;  %v34_v3 = vld [vmem:[%s626_s2] sm:$0xff]  ;;  %422 = vmatpush3.xpose.msk.msra.mxu0 %vm58_vm0, %v29_v1 }
   0x6   :  { %40 = vperm.xlu0 %473, %v34_v3   ;;  %474 = vset.pattern.permute.xlu1 %v499_v5 }
   0x7   :  { %50 = vperm.xlu1 %474, %v36_v6  }
   0x8   :  { %14 = vsyncpa [#allocation4], 0  ;;  %424 = vmatmul.mubr.msk.f32.vlgmr.msra.gmra.mrb[0].mxu0 %vm58_vm0, %v31_v4  ;;  %v37_v9 = vld [vmem:[%s626_s2 + $0x18] sm:$0xff]  ;;  %v167_v11 = vld [vmem:[%s628_s4] sm:$0xff]  ;;  %vm191_vm1 = vcmask 261120   ;;  %v500_v38 = vmov 0.0|0.0   ;;  %v300_v59 = vlaneseq }
   0x9   :  { %426 = vmatprep.mubr.msk.f32.mxu0 %vm58_vm0, %v32_v7  ;;  %v33_v10 = vld [vmem:[%s625_s1 + $0x18] sm:$0xff]  ;;  %v168_v12 = vld [vmem:[%s628_s4 + $0x8] sm:$0xff]  ;;  %v169_v13 = vld [vmem:[%s628_s4 + $0x10] sm:$0xff]  ;;  %462 = vmatprep.subr.bf16.mxu0 %v500_v38  ;;  %vm501_vm2 = vmmov 0   ;;  %v502_v39 = vmov 0.0   ;;  %s503_s9 = smov [#allocation3]  }
   0xa   :  { %45 = vperm.xlu0 %473, %v35_v8   ;;  %v170_v14 = vld [vmem:[%s628_s4 + $0x18] sm:$0xff]  ;;  %v294_v15 = vld [vmem:[#allocation2] sm:$0x1]  ;;  %v164_v35 = vld [vmem:[%s627_s3 + $0x8] sm:$0xff]  ;;  %v301_v60 = vshrl.u32 %v300_v59, 7  ;;  %s385_s0 = sshll.u32 %s503_s9, 4  ;;  %s386_s0 = int_to_ptr.vmem [resolvable:$true] %s385_s0 }
   0xb   :  { %55 = vperm.xlu1 %474, %v37_v9   ;;  %v163_v16 = vld [vmem:[%s627_s3] sm:$0xff]  ;;  %v165_v36 = vld [vmem:[%s627_s3 + $0x10] sm:$0xff]  ;;  %v166_v37 = vld [vmem:[%s627_s3 + $0x18] sm:$0xff]  ;;  %vm377_vm3 = vcmask 8192   ;;  %s475_s10 = scalar_lea.vmem %s386_s0, 16  ;;  %s479_s11 = scalar_lea.vmem %s386_s0, 32 }
   0xc   :  { %427 = vmatmul.mubr.msk.f32.gmra.mrb[2].mxu0 %vm58_vm0, %v33_v10  ;;  %437 = vmatprep.mubr.msk.f32.mxu1 %vm191_vm1, %v163_v16  ;;  %v293_v58 = vld [vmem:[%s629_s5] sm:$0x1]  ;;  %v302_v61 = vsub.s32 0, %v301_v60  ;;  %p476_p0 = scmp.ne.s32.totalorder %s386_s0, %s475_s10  ;;  %p480_p1 = scmp.lt.s32.totalorder %s386_s0, %s386_s0 }
   0xd   :  { %451 = vmatprep.mubr.msk.f32.mxu0 %vm501_vm2, %v502_v39  ;;  %p481_p2 = scmp.lt.s32.totalorder %s479_s11, %s475_s10 }
   0xe   :  { %173 = vperm.xlu0 %473, %v167_v11  }
   0xf   :  { %178 = vperm.xlu1 %474, %v168_v12   ;;  %p482_p3 = por %p481_p2, %p480_p1 }
  0x11   :  { %p483_p4 = pnand %p482_p3, %p476_p0 }
  0x12   :  { %183 = vperm.xlu0 %473, %v169_v13  }
  0x13   :  { %188 = vperm.xlu1 %474, %v170_v14  }
  0x16   :  { %297 = vperm.xlu0 %473, %v294_v15  }
  0x85   :  { %v41_v17 = vpop.permute.xlu0 %40 }
  0x86   :  { %v51_v18 = vpop.permute.xlu1 %50 }
  0x89   :  { %v46_v19 = vpop.permute.xlu0 %45 }
  0x8a   :  { %v56_v25 = vpop.permute.xlu1 %55 }
  0x8d   :  { %v174_v41 = vpop.permute.xlu0 %173 }
  0x8e   :  { %v179_v40 = vpop.permute.xlu1 %178 }
  0x91   :  { %v184_v50 = vpop.permute.xlu0 %183 }
  0x92   :  { %v189_v47 = vpop.permute.xlu1 %188 }
  0x95   :  { %v298_v62 = vpop.permute.xlu0 %297 }
  0x96   :  { %v303_v63 = vrot.slane %v298_v62, %v302_v61 }
  0xdb   :  { %v425_v20 = vpop.f32.mrb[0].mxu0 }
  0xdc   :  { %v146_v21 = vadd.f32 %v425_v20, %v46_v19  ;;  %v140_v22 = vpop.f32.mrb[1].mxu0 }
  0xdd   :  { %v141_v23 = vadd.f32 %v140_v22, %v41_v17 }
  0xde   :  { %v160_v24 = vmax.f32 %v146_v21, 0.0 }
  0xdf   :  { %v159_v26 = vmax.f32 %v141_v23, 0.0  ;;  %v428_v27 = vpop.f32.mrb[2].mxu0 }
  0xe0   :  { %v156_v28 = vadd.f32 %v428_v27, %v56_v25  ;;  %v150_v29 = vpop.f32.mrb[3].mxu0 }
  0xe1   :  { %v151_v30 = vadd.f32 %v150_v29, %v51_v18  ;;  %v454_v31 = vpack.c.bf16 %v160_v24, %v159_v26 }
  0xe2   :  { %v162_v32 = vmax.f32 %v156_v28, 0.0 }
  0xe3   :  { %v161_v33 = vmax.f32 %v151_v30, 0.0  ;;  %455 = vmatprep.subr.bf16.mxu1 %v454_v31 }
  0xe4   :  { %457 = vmatpush3.bf16.msra.mxu1 %v454_v31 }
  0xe5   :  { %v458_v34 = vpack.c.bf16 %v162_v32, %v161_v33 }
  0xe7   :  { %459 = vmatprep.subr.bf16.mxu1 %v458_v34 }
  0xe8   :  { %461 = vmatpush3.bf16.msra.mxu1 %v458_v34 }
  0xeb   :  { %438 = vmatmul.mubr.msk.f32.vlgmr.msra.gmra.mrb[0].mxu1 %vm191_vm1, %v164_v35 }
  0xec   :  { %440 = vmatprep.mubr.msk.f32.mxu1 %vm191_vm1, %v165_v36 }
  0xef   :  { %441 = vmatmul.mubr.msk.f32.gmra.mrb[2].mxu1 %vm191_vm1, %v166_v37 }
 0x1be   :  { %v439_v42 = vpop.f32.mrb[0].mxu1 }
 0x1bf   :  { %v276_v43 = vadd.f32 %v439_v42, %v179_v40  ;;  %v270_v44 = vpop.f32.mrb[1].mxu1 }
 0x1c0   :  { %v271_v45 = vadd.f32 %v270_v44, %v174_v41 }
 0x1c1   :  { %v290_v46 = vmax.f32 %v276_v43, 0.0 }
 0x1c2   :  { %v289_v48 = vmax.f32 %v271_v45, 0.0  ;;  %v442_v49 = vpop.f32.mrb[2].mxu1 }
 0x1c3   :  { %v286_v51 = vadd.f32 %v442_v49, %v189_v47  ;;  %v280_v52 = vpop.f32.mrb[3].mxu1 }
 0x1c4   :  { %v463_v53 = vpack.c.bf16 %v290_v46, %v289_v48  ;;  %v281_v54 = vadd.f32 %v280_v52, %v184_v50 }
 0x1c5   :  { %v292_v55 = vmax.f32 %v286_v51, 0.0 }
 0x1c6   :  { %v291_v56 = vmax.f32 %v281_v54, 0.0  ;;  %464 = vmatpush3.bf16.msra.mxu0 %v463_v53 }
 0x1c7   :  { %465 = vmatprep.subr.bf16.mxu0 %v500_v38 }
 0x1c8   :  { %v466_v57 = vpack.c.bf16 %v292_v55, %v291_v56 }
 0x1ca   :  { %467 = vmatpush3.bf16.msra.mxu0 %v466_v57 }
 0x1cd   :  { %452 = vmatmul.mubr.msk.f32.vlgmr.msra.gmra.mrb[4].mxu0 %vm191_vm1, %v293_v58 }
 0x2a0   :  { %v373_v0 = vpop.f32.mrb[4].mxu0 }
 0x2a1   :  { %v374_v1 = vadd.f32 %v373_v0, %v303_v63  ;;  %v453_v2 = vpop.f32.mrb[5].mxu0 }
 0x2a3   :  { %378 = vst.msk [vmem:[#allocation3] sm:$0x1] %vm377_vm3, %v374_v1 }
 0x2a4   :  { %486 = shalt.err (!%p483_p4)
}
 0x2a5   :  { %s487_s13 = scalar_lea.hbm %s631_s7, 16 }
 0x2a6   :  { %p488_p5 = scmp.ne.s32.totalorder %s631_s7, %s487_s13  ;;  %p491_p6 = scmp.lt.u32.totalorder %s487_s13, %s631_s7 }
 0x2a8   :  { %p493_p7 = pnand %p491_p6, %p488_p5 }
 0x2aa   :  { %496 = shalt.err (!%p493_p7)
}
 0x2ab   :  { %388 = dma.vmem_to_hbm [thread:$0]  %s386_s0, 16, %s631_s7, [#allocation4]  }
 0x2ac   :  { %497 = dma.done.wait [#allocation4], 16  }
 0x2ad   :  { %498 = vsyncadd [#allocation4], 4294967280 }
 0x2ae   :  { %392 = vsyncpa [#allocation4], 1 }

</bundles_post_ra>
